<compile_context>
chip_gen: v7x
topology: tpu7x:2x2x1
jax: 0.10.0
libtpu: 0.0.40
codegen_flags: <defaults>
</compile_context>

<pallas_src>
import math

import jax
import jax.numpy as jnp
from jax import lax
from jax.experimental import pallas as pl
from jax.experimental.pallas import tpu as pltpu


def _row_tile(m):
    # whole-array tiles for small problems, 512-row tiles otherwise
    return m if m <= 512 else 512


def _q_tile(n):
    # query-tile size: whole sequence when small, else the largest nice divisor
    if n <= 512:
        return n
    for t in (512, 256, 128, 64, 32, 16, 8):
        if n % t == 0:
            return t
    return n  # TODO(synk): pad ragged N to a multiple of 8 instead of one huge tile


def _attn_vmem_limit(tq, n, hd):
    # per-step blocks: q (tq,hd) + k/v (n,hd)*2 + bias (tq,n) in bf16, out f32
    blk = (tq * hd + 2 * n * hd + tq * n) * 2 + tq * hd * 4
    need = 3 * blk + (2 << 20)                 # ~double/triple buffering + slack
    if need <= 16 * 1024 * 1024:               # fits the smallest default scoped limit
        return None
    try:
        cap = pltpu.get_tpu_info().vmem_capacity_bytes
    except Exception:
        cap = 64 * 1024 * 1024                 # v7x per-TC physical VMEM
    return int(min(need, cap - 8 * 1024 * 1024))


# ---------------------------------------------------------------------------
# QKV projection:  out[s, h] = (x @ W_{s,h}^T + b_{s,h}) * m_s,  bf16 output.
# Output layout (3, H, M, hd): heads on a leading axis so the attention kernel
# never slices heads along the lane dimension.  m_s zeroes Q/K rows of masked
# nodes (m_V == 1), which lets the attention kernel use a single bias add.
# ---------------------------------------------------------------------------
def _qkv_proj_kernel(x_ref, w_ref, b_ref, m_ref, o_ref):
    acc = lax.dot_general(x_ref[...], w_ref[...], (((1,), (1,)), ((), ())),
                          preferred_element_type=jnp.float32)         # (tm, hd)
    o_ref[...] = ((acc + b_ref[...]) * m_ref[...]).astype(o_ref.dtype)


def qkv_proj_pallas(x2d, w4, b4, qk_mult):
    M, Din = x2d.shape
    _, H, hd, _ = w4.shape
    tm = _row_tile(M)
    return pl.pallas_call(
        _qkv_proj_kernel,
        out_shape=jax.ShapeDtypeStruct((3, H, M, hd), jnp.bfloat16),
        grid_spec=pltpu.PrefetchScalarGridSpec(
            num_scalar_prefetch=0,
            grid=(pl.cdiv(M, tm), 3, H),        # x tile stays resident over (s, h)
            in_specs=[
                pl.BlockSpec((tm, Din), lambda i, s, h: (i, 0)),
                pl.BlockSpec((None, None, hd, Din), lambda i, s, h: (s, h, 0, 0)),
                pl.BlockSpec((None, None, 1, hd), lambda i, s, h: (s, h, 0, 0)),
                pl.BlockSpec((None, tm, 1), lambda i, s, h: (s, i, 0)),
            ],
            out_specs=pl.BlockSpec((None, None, tm, hd),
                                   lambda i, s, h: (s, h, i, 0)),
        ),
        compiler_params=pltpu.CompilerParams(
            dimension_semantics=("parallel", "parallel", "parallel")),
    )(x2d, w4, b4, qk_mult)


# ---------------------------------------------------------------------------
# Fused edge FFN, applied twice (same weights), one pallas_call.  Only used
# when edge_attr_dim is lane-friendly (>= 128); tiny De is left to XLA.
# ---------------------------------------------------------------------------
def _edge_ffn2_kernel(x_ref, w1_ref, b1_ref, w2_ref, b2_ref, o_ref):
    h = x_ref[...]
    for _ in range(2):                      # edge_ffn called twice in reference
        h = jnp.maximum(
            lax.dot_general(h.astype(jnp.bfloat16), w1_ref[...],
                            (((1,), (1,)), ((), ())),
                            preferred_element_type=jnp.float32) + b1_ref[...], 0.0)
        h = lax.dot_general(h.astype(jnp.bfloat16), w2_ref[...],
                            (((1,), (1,)), ((), ())),
                            preferred_element_type=jnp.float32) + b2_ref[...]
    o_ref[...] = h


def edge_ffn2_pallas(x2d, w1, b1, w2, b2):
    M, D = x2d.shape
    Dh = w1.shape[0]
    tm = _row_tile(M)
    return pl.pallas_call(
        _edge_ffn2_kernel,
        out_shape=jax.ShapeDtypeStruct((M, D), jnp.float32),
        grid_spec=pltpu.PrefetchScalarGridSpec(
            num_scalar_prefetch=0,
            grid=(pl.cdiv(M, tm),),
            in_specs=[
                pl.BlockSpec((tm, D), lambda i: (i, 0)),
                pl.BlockSpec((Dh, D), lambda i: (0, 0)),
                pl.BlockSpec((1, Dh), lambda i: (0, 0)),
                pl.BlockSpec((D, Dh), lambda i: (0, 0)),
                pl.BlockSpec((1, D), lambda i: (0, 0)),
            ],
            out_specs=pl.BlockSpec((tm, D), lambda i: (i, 0)),
        ),
        compiler_params=pltpu.CompilerParams(dimension_semantics=("parallel",)),
    )(x2d.astype(jnp.bfloat16), w1.astype(jnp.bfloat16),
      b1.reshape(1, -1).astype(jnp.float32), w2.astype(jnp.bfloat16),
      b2.reshape(1, -1).astype(jnp.float32))


# ---------------------------------------------------------------------------
# Attention kernel: one (batch b, head h, q-tile) per grid step.
#   s    = q_tile @ k^T + bias_strip      (bias carries edge attrs, self-loop
#                                          diagonal and the -1e6 mask fill)
#   out  = (exp(s - max) @ v) * 1/rowsum  (normalization deferred past P@V)
# ---------------------------------------------------------------------------
def _attn_kernel(q_ref, k_ref, v_ref, bias_ref, o_ref):
    s = lax.dot_general(q_ref[...], k_ref[...], (((1,), (1,)), ((), ())),
                        preferred_element_type=jnp.float32)           # (tq, N)
    s = s + bias_ref[...].astype(jnp.float32)                         # single add
    # TODO(synk): on v6e/v7x the exp chain could run in bf16 (keep rowsum f32).
    p = jnp.exp(s - jnp.max(s, axis=-1, keepdims=True))
    rsum = jnp.sum(p, axis=-1, keepdims=True)
    o = lax.dot_general(p.astype(jnp.bfloat16), v_ref[...],
                        (((1,), (0,)), ((), ())),
                        preferred_element_type=jnp.float32)           # (tq, hd)
    o_ref[...] = o * pl.reciprocal(rsum, approx=True)


# ---------------------------------------------------------------------------
# Full forward pass
# ---------------------------------------------------------------------------
def moire_attention_forward(params, x, adj, edge_index, edge_attr, mask):
    del adj  # dead code in reference (moire_adj result is overwritten)
    B, N, Din = x.shape
    H = params["num_heads"]
    hd = params["head_dim"]
    Dout = H * hd
    M = B * N
    if mask is None:
        mask = jnp.ones((B, N), dtype=bool)

    # ---- fold 1/sqrt(hd) into the Q rows of the projection weights (f32, exact) ----
    inv = 1.0 / math.sqrt(hd)
    scale = jnp.concatenate([jnp.full((Dout,), inv, jnp.float32),
                             jnp.ones((2 * Dout,), jnp.float32)])
    w4 = (params["qkv_w"].astype(jnp.float32) * scale[:, None]
          ).reshape(3, H, hd, Din).astype(jnp.bfloat16)
    b4 = (params["qkv_b"].astype(jnp.float32) * scale).reshape(3, H, 1, hd)

    # ---- zero Q/K rows of masked nodes (V untouched) so that `qk + bias`
    #      reproduces masked_fill exactly (masked scores == fill value). ----
    mrow = mask.astype(jnp.float32).reshape(M, 1)
    qk_mult = jnp.stack([mrow, mrow, jnp.ones_like(mrow)], axis=0)     # (3, M, 1)

    qkv3 = qkv_proj_pallas(x.reshape(M, Din).astype(jnp.bfloat16), w4, b4, qk_mult)

    # ---- edge FFN applied twice ----
    E, De = edge_attr.shape[1], edge_attr.shape[2]
    assert De == H, "edge_attr_dim must equal num_heads (required by reference +=)"
    if De >= 128:
        ea = edge_ffn2_pallas(edge_attr.reshape(B * E, De),
                              params["ffn_w1"], params["ffn_b1"],
                              params["ffn_w2"], params["ffn_b2"]).reshape(B, E, De)
    else:
        # tiny De: Pallas launch/layout overhead exceeds the work; let XLA fuse it
        ea = edge_attr
        for _ in range(2):
            h1 = jnp.maximum(ea @ params["ffn_w1"].T + params["ffn_b1"], 0.0)
            ea = h1 @ params["ffn_w2"].T + params["ffn_b2"]

    # ---- dense (B,H,N,N) bf16 bias: edge scatter + self-loop diag + mask fill.
    # Data-dependent scatter-add has no clean Pallas equivalent; done as XLA
    # glue.  Matches `scores[b][:, ei0, ei1] += edge_attr[b].T` (distinct edges).
    # TODO(synk): for large N, scalar-prefetch edge_index/ea and apply the E
    # sparse additions in-kernel instead of materializing B*H*N^2 bias.
    slw = params["self_loop_w"].reshape(H, 1, 1).astype(jnp.float32)
    eye = jnp.eye(N, dtype=jnp.float32)

    def build_bias(ei, ea_b, mask_b):
        z = jnp.zeros((H, N, N), jnp.float32)
        z = z.at[:, ei[0], ei[1]].add(jnp.transpose(ea_b))
        z = z + eye[None] * slw
        m2d = mask_b[:, None] & mask_b[None, :]
        return jnp.where(m2d[None], z, -1000000.0).astype(jnp.bfloat16)

    bias = jax.vmap(build_bias)(edge_index, ea, mask)                  # (B,H,N,N)

    # ---- attention: grid (B, H, N // tq), per-head per-q-tile blocks ----
    tq = _q_tile(N)
    nq = N // tq
    # NOTE: a further knob is pipeline_mode=pl.Buffered(3) on the bias strip.
    out = pl.pallas_call(
        _attn_kernel,
        out_shape=jax.ShapeDtypeStruct((B, H, N, hd), jnp.float32),
        grid_spec=pltpu.PrefetchScalarGridSpec(
            num_scalar_prefetch=0,
            grid=(B, H, nq),
            in_specs=[
                pl.BlockSpec((None, None, tq, hd),
                             lambda b, h, q: (0, h, b * nq + q, 0)),   # Q tile
                pl.BlockSpec((None, None, N, hd),
                             lambda b, h, q: (1, h, b, 0)),            # K (resident over q)
                pl.BlockSpec((None, None, N, hd),
                             lambda b, h, q: (2, h, b, 0)),            # V (resident over q)
                pl.BlockSpec((None, None, tq, N),
                             lambda b, h, q: (b, h, q, 0)),            # bias strip
            ],
            out_specs=pl.BlockSpec((None, None, tq, hd),
                                   lambda b, h, q: (b, h, q, 0)),
        ),
        compiler_params=pltpu.CompilerParams(
            dimension_semantics=("parallel", "parallel", "parallel"),
            vmem_limit_bytes=_attn_vmem_limit(tq, N, hd)),
    )(qkv3, qkv3, qkv3, bias)

    # (B,H,N,hd) -> (B,N,H*hd); cheap XLA layout pass, small vs the N^2 bias traffic
    return jnp.transpose(out, (0, 2, 1, 3)).reshape(B, N, Dout)


# ---------------------------------------------------------------------------
# Pure-JAX f32 reference (mirrors the PyTorch forward, eval mode)
# ---------------------------------------------------------------------------
def reference_forward(params, x, adj, edge_index, edge_attr, mask):
    del adj
    B, N, _ = x.shape
    H, hd = params["num_heads"], params["head_dim"]
    qkv = x @ params["qkv_w"].T + params["qkv_b"]
    qkv = qkv.reshape(B, N, 3, H, hd).transpose(2, 0, 3, 1, 4)
    Q, K, V = qkv[0], qkv[1], qkv[2]
    ea = edge_attr
    for _ in range(2):
        h1 = jnp.maximum(ea @ params["ffn_w1"].T + params["ffn_b1"], 0.0)
        ea = h1 @ params["ffn_w2"].T + params["ffn_b2"]
    scores = jnp.einsum("bhnd,bhmd->bhnm", Q, K) / math.sqrt(hd)
    scores = jax.vmap(
        lambda s_b, ei, ea_b: s_b.at[:, ei[0], ei[1]].add(ea_b.T)
    )(scores, edge_index, ea)
    eye = jnp.eye(N, dtype=jnp.float32)
    adj_scores = scores + eye[None, None] * params["self_loop_w"].reshape(1, H, 1, 1)
    mask2d = mask[:, None, :] & mask[:, :, None]
    adj_scores = jnp.where(mask2d[:, None], adj_scores, -1000000.0)
    attn = jax.nn.softmax(adj_scores, axis=-1)
    out = jnp.einsum("bhnm,bhmd->bhnd", attn, V)
    return out.transpose(0, 2, 1, 3).reshape(B, N, H * hd)


# ---------------------------------------------------------------------------
# Deterministic parameter init (PyTorch Linear-style uniform bounds)
# ---------------------------------------------------------------------------
def init_params(key, input_dim, output_dim, num_heads, edge_attr_dim):
    head_dim = output_dim // num_heads
    ks = jax.random.split(key, 4)

    def lin(k, out_d, in_d):
        bound = 1.0 / math.sqrt(in_d)
        kw, kb = jax.random.split(k)
        w = jax.random.uniform(kw, (out_d, in_d), jnp.float32, -bound, bound)
        b = jax.random.uniform(kb, (out_d,), jnp.float32, -bound, bound)
        return w, b

    qkv_w, qkv_b = lin(ks[0], 3 * output_dim, input_dim)
    ffn_w1, ffn_b1 = lin(ks[1], edge_attr_dim, edge_attr_dim)
    ffn_w2, ffn_b2 = lin(ks[2], edge_attr_dim, edge_attr_dim)
    # self_loop_W = 1/head_dim + U(0,1) per head (non-trainable in reference)
    self_loop_w = 1.0 / head_dim + jax.random.uniform(
        ks[3], (num_heads,), jnp.float32
    )
    return {
        "qkv_w": qkv_w, "qkv_b": qkv_b,
        "ffn_w1": ffn_w1, "ffn_b1": ffn_b1,
        "ffn_w2": ffn_w2, "ffn_b2": ffn_b2,
        "self_loop_w": self_loop_w,
        "num_heads": num_heads, "head_dim": head_dim,
    }


if __name__ == "__main__":
    B, N, Din = 2, 16, 16
    H, hd = 4, 8
    Dout = H * hd
    De = H          # edge_attr_dim must equal num_heads (required by reference +=)
    E = 20

    key = jax.random.PRNGKey(0)
    kx, kadj, kei, kea, kmask, kparam = jax.random.split(key, 6)

    x = jax.random.normal(kx, (B, N, Din), jnp.float32)
    adj = (jax.random.uniform(kadj, (B, N, N)) > 0.5).astype(jnp.float32)

    # distinct edges per batch (advanced-index += in PyTorch does not dedup)
    flat = jax.vmap(
        lambda k: jax.random.choice(k, N * N, (E,), replace=False)
    )(jax.random.split(kei, B))
    edge_index = jnp.stack([flat // N, flat % N], axis=1).astype(jnp.int32)  # (B,2,E)

    edge_attr = jax.random.normal(kea, (B, E, De), jnp.float32)
    mask = jax.random.uniform(kmask, (B, N)) > 0.2                           # (B,N) bool

    params = init_params(kparam, Din, Dout, H, De)

    out = moire_attention_forward(params, x, adj, edge_index, edge_attr, mask)
    out = jax.block_until_ready(out)

    ref = reference_forward(params, x, adj, edge_index, edge_attr, mask)
    assert out.shape == (B, N, Dout)
    # bf16 MXU path (Q/K/V, P@V, edge bias) + approx reciprocal => loosened tol
    assert jnp.allclose(out, ref, rtol=5e-2, atol=5e-2), "kernel/reference mismatch"

    print("KERNEL_OK")
</pallas_src>

<mosaic_0001>
module attributes {stable_mosaic.version = 11 : i64} {
  func.func @_qkv_proj_kernel(%arg0: i32, %arg1: i32, %arg2: i32, %arg3: memref<32x16xbf16, #tpu.memory_space<vmem>>, %arg4: memref<1x1x8x16xbf16, #tpu.memory_space<vmem>>, %arg5: memref<1x1x1x8xf32, #tpu.memory_space<vmem>>, %arg6: memref<1x32x1xf32, #tpu.memory_space<vmem>>, %arg7: memref<1x1x32x8xbf16, #tpu.memory_space<vmem>>) attributes {dimension_semantics = [#tpu.dimension_semantics<parallel>, #tpu.dimension_semantics<parallel>, #tpu.dimension_semantics<parallel>], iteration_bounds = array<i64: 1, 3, 4>, scalar_prefetch = 0 : i64, scratch_operands = 0 : i64, tpu.core_type = #tpu.core_type<tc>, window_params = [{transform_indices = @transform_0, window_bounds = array<i64: 32, 16>}, {transform_indices = @transform_1, window_bounds = array<i64: 1, 1, 8, 16>}, {transform_indices = @transform_2, window_bounds = array<i64: 1, 1, 1, 8>}, {transform_indices = @transform_3, window_bounds = array<i64: 1, 32, 1>}, {transform_indices = @transform_4, window_bounds = array<i64: 1, 1, 32, 8>}]} {
    %c0 = arith.constant 0 : index
    %c0_0 = arith.constant 0 : index
    %0 = vector.load %arg3[%c0, %c0_0] : memref<32x16xbf16, #tpu.memory_space<vmem>>, vector<32x16xbf16>
    %c0_1 = arith.constant 0 : index
    %c0_2 = arith.constant 0 : index
    %c0_3 = arith.constant 0 : index
    %c0_4 = arith.constant 0 : index
    %1 = vector.load %arg4[%c0_1, %c0_2, %c0_3, %c0_4] : memref<1x1x8x16xbf16, #tpu.memory_space<vmem>>, vector<1x1x8x16xbf16>
    %2 = vector.shape_cast %1 : vector<1x1x8x16xbf16> to vector<8x16xbf16>
    %cst = arith.constant dense<0.000000e+00> : vector<32x8xf32>
    %3 = tpu.matmul %0, %2, %cst {dimension_numbers = #tpu.dot_dimension_numbers<[1], [1], [0], [0], [0, 0, 1, 0], [], []>} : vector<32x16xbf16>, vector<8x16xbf16>, vector<32x8xf32> -> vector<32x8xf32>
    %c0_5 = arith.constant 0 : index
    %c0_6 = arith.constant 0 : index
    %c0_7 = arith.constant 0 : index
    %c0_8 = arith.constant 0 : index
    %4 = vector.load %arg5[%c0_5, %c0_6, %c0_7, %c0_8] : memref<1x1x1x8xf32, #tpu.memory_space<vmem>>, vector<1x1x1x8xf32>
    %5 = vector.shape_cast %4 : vector<1x1x1x8xf32> to vector<1x8xf32>
    %6 = vector.broadcast %5 : vector<1x8xf32> to vector<32x8xf32>
    %7 = arith.addf %3, %6 : vector<32x8xf32>
    %c0_9 = arith.constant 0 : index
    %c0_10 = arith.constant 0 : index
    %c0_11 = arith.constant 0 : index
    %8 = vector.load %arg6[%c0_9, %c0_10, %c0_11] : memref<1x32x1xf32, #tpu.memory_space<vmem>>, vector<1x32x1xf32>
    %9 = vector.shape_cast %8 : vector<1x32x1xf32> to vector<32x1xf32>
    %10 = vector.broadcast %9 : vector<32x1xf32> to vector<32x8xf32>
    %11 = arith.mulf %7, %10 : vector<32x8xf32>
    %12 = arith.truncf %11 : vector<32x8xf32> to vector<32x8xbf16>
    %c0_12 = arith.constant 0 : index
    %c0_13 = arith.constant 0 : index
    %c0_14 = arith.constant 0 : index
    %c0_15 = arith.constant 0 : index
    %13 = vector.load %arg7[%c0_12, %c0_13, %c0_14, %c0_15] : memref<1x1x32x8xbf16, #tpu.memory_space<vmem>>, vector<1x1x32x8xbf16>
    %14 = vector.shape_cast %13 : vector<1x1x32x8xbf16> to vector<32x8xbf16>
    %15 = vector.shape_cast %12 : vector<32x8xbf16> to vector<1x1x32x8xbf16>
    tpu.vector_store %arg7[%c0_12, %c0_13, %c0_14, %c0_15], %15 {strides = array<i32>} : memref<1x1x32x8xbf16, #tpu.memory_space<vmem>>, vector<1x1x32x8xbf16>,
    return
  }
  func.func @transform_0(%arg0: i32, %arg1: i32, %arg2: i32) -> (i32, i32) {
    %c0_i32 = arith.constant 0 : i32
    %c0_i32_0 = arith.constant 0 : i32
    return %arg0, %c0_i32 : i32, i32
  }
  func.func @transform_1(%arg0: i32, %arg1: i32, %arg2: i32) -> (i32, i32, i32, i32) {
    %c0_i32 = arith.constant 0 : i32
    %c0_i32_0 = arith.constant 0 : i32
    %c0_i32_1 = arith.constant 0 : i32
    return %arg1, %arg2, %c0_i32, %c0_i32_0 : i32, i32, i32, i32
  }
  func.func @transform_2(%arg0: i32, %arg1: i32, %arg2: i32) -> (i32, i32, i32, i32) {
    %c0_i32 = arith.constant 0 : i32
    %c0_i32_0 = arith.constant 0 : i32
    %c0_i32_1 = arith.constant 0 : i32
    return %arg1, %arg2, %c0_i32, %c0_i32_0 : i32, i32, i32, i32
  }
  func.func @transform_3(%arg0: i32, %arg1: i32, %arg2: i32) -> (i32, i32, i32) {
    %c0_i32 = arith.constant 0 : i32
    %c0_i32_0 = arith.constant 0 : i32
    return %arg1, %arg0, %c0_i32 : i32, i32, i32
  }
  func.func @transform_4(%arg0: i32, %arg1: i32, %arg2: i32) -> (i32, i32, i32, i32) {
    %c0_i32 = arith.constant 0 : i32
    %c0_i32_0 = arith.constant 0 : i32
    return %arg1, %arg2, %arg0, %c0_i32 : i32, i32, i32, i32
  }
}

</mosaic_0001>

<bundles_post_ra>
// kernel: tpu_custom_call.1
= control target key start
LH: loop header
LB: loop body
LE: loop exit
PB: predicated region body
PF: predicated region fallthrough
CT: control target
= control target key end

     0   :  { %s774_s15 = smov 0   ;;  %s776_s16 = smov 0   ;;  %s844_s0 = inlined_call_operand.vmem [shape: bf16[32,16], index: 0, kind: input, shape index: {}]   ;;  %s845_s1 = inlined_call_operand.vmem [shape: bf16[3,4,8,16], index: 1, kind: input, shape index: {}]   ;;  %s846_s2 = inlined_call_operand.vmem [shape: f32[3,4,1,8], index: 2, kind: input, shape index: {}]   ;;  %s847_s3 = inlined_call_operand.vmem [shape: f32[3,32,1], index: 3, kind: input, shape index: {}]   ;;  %s848_s4 = inlined_call_operand.vmem [shape: bf16[3,4,32,8], index: 4, kind: output, shape index: {}]  }
   0x1   :  { %s778_s17 = smov 0   ;;  %s780_s18 = smov 0  }
   0x2   :  { %s782_s19 = smov 0  }
   0x3 LB: > { %s26_s20 = sadd.s32 1, %s738_s17  ;;  %s29_s21 = sadd.s32 1, %s742_s18  ;;  %s746_s19 = sphi %s782_s19, %s14_s19   ;;  %s742_s18 = sphi %s780_s18, %s852_s18   ;;  %s738_s17 = sphi %s778_s17, %s851_s17   ;;  %s734_s16 = sphi %s776_s16, %s850_s16   ;;  %s730_s15 = sphi %s774_s15, %s849_s15  }
   0x4   : > { %p27_p0 = scmp.ge.s32.totalorder %s26_s20, 4  ;;  %p628_p1 = scmp.ge.s32.totalorder %s746_s19, 1 }
   0x5   : > { %p232_p2 = scmp.lt.s32.totalorder %s746_s19, 13 }
   0x6   : > { %s854_s20 = smov (%p27_p0, %s26_s20), 0  ;;  %s856_s21 = smov (!%p27_p0, %s29_s21), %s742_s18 }
   0x7   : > { %p233_p3 = pnand %p628_p1, %p232_p2  ;;  %p31_p4 = scmp.ge.s32.totalorder %s856_s21, 3 }
   0x8   : > { %p296_p5 = scmp.lt.s32.totalorder (!%p233_p3), %s734_s16, 2  ;;  %p298_p6 = scmp.lt.s32.totalorder (!%p233_p3), %s730_s15, 3  ;;  %vm358_vm0 = vcmask (!%p233_p3), 130048   ;;  %v706_v0 = vld [vmem:[%s844_s0] sm:$0xff] (!%p233_p3)   ;;  %v748_v1 = vmov (!%p233_p3), 0   ;;  %v707_v8 = vld [vmem:[%s844_s0 + $0x8] sm:$0xff] (!%p233_p3)  }
   0x9   : > { %s858_s21 = smov (%p31_p4, %s856_s21), 0  ;;  %236 = sbr.rel (%p233_p3) target bundleno = 252 (0xfc), region = 36 }
   0xa   : > { %658 = vmatprep.mubr.msk.bf16.mxu0 (!%p233_p3), %vm358_vm0, %v706_v0  ;;  %705 = vset.pattern.permute.xlu1 (!%p233_p3), %v748_v1  ;;  %vm461_vm1 = vcmask (!%p233_p3), 60416  }
   0xb   : > { %704 = vset.pattern.permute.xlu0 (!%p233_p3), %v748_v1 }
  0x10   : > { %s860_s16 = smov (!%p296_p5, %s734_s16), 2  ;;  %s862_s15 = smov (!%p298_p6, %s730_s15), 3 }
  0x11   : > { %s629_s24 = sshll.u32 %s860_s16, 2  ;;  %s635_s25 = sshll.u32 %s860_s16, 4 }
  0x12   : > { %s301_s26 = sadd.s32 %s629_s24, %s862_s15  ;;  %s634_s27 = sshll.u32 %s862_s15, 2 }
  0x13   : > { %s630_s28 = sshll.u32 %s301_s26, 2  ;;  %s811_s6 = sadd.s32 %s635_s25, %s634_s27 }
  0x14   : > { %s303_s5 = scalar_lea.vmem %s845_s1, %s630_s28  ;;  %s648_s7 = sshll.u32 %s860_s16, 5 }
  0x15   : > { %v340_v2 = vld [vmem:[%s303_s5] sm:$0xf]  ;;  %s319_s10 = scalar_lea.vmem %s847_s3, %s648_s7  ;;  %s310_s15 = scalar_lea.vmem %s846_s2, %s301_s26 }
  0x16   : > { %662 = vmatprep.subr.msk.bf16.mxu0 %vm358_vm0, %v340_v2  ;;  %v366_v3 = vsel %vm358_vm0, %v340_v2, 0  ;;  %v419_v4 = vld [vmem:[%s319_s10 + $0x10] sm:$0xff]  ;;  %v417_v5 = vld [vmem:[%s319_s10] sm:$0xff]  ;;  %v420_v6 = vld [vmem:[%s319_s10 + $0x18] sm:$0xff]  ;;  %s636_s16 = sshll.u32 %s811_s6, 2 }
  0x17   : > { %657 = vmatpush3.bf16.xpose.msra.mxu0 %v366_v3  ;;  %433 = vperm.xlu1 %705, %v419_v4   ;;  %v418_v7 = vld [vmem:[%s319_s10 + $0x8] sm:$0xff]  ;;  %v637_v9 = vld [vmem:[%s310_s15] ss:$0 sm:$0xff]  ;;  %s333_s24 = scalar_lea.vmem %s848_s4, %s636_s16 }
  0x18   : > { %423 = vperm.xlu0 %704, %v417_v5  }
  0x1b   : > { %438 = vperm.xlu1 %705, %v420_v6  }
  0x1c   : > { %428 = vperm.xlu0 %704, %v418_v7  }
  0x1e   : > { %659 = vmatmul.mubr.msk.bf16.vlgmr.msra.gmra.mrb[0].mxu0 %vm358_vm0, %v707_v8 }
  0x96   : > { %v434_v10 = vpop.permute.xlu1 %433 }
  0x97   : > { %v424_v11 = vpop.permute.xlu0 %423 }
  0x9a   : > { %v439_v20 = vpop.permute.xlu1 %438 }
  0x9b   : > { %v429_v24 = vpop.permute.xlu0 %428 }
  0xf1   : > { %v660_v12 = vpop.f32.mrb[0].mxu0 }
  0xf2   : > { %v411_v13 = vadd.f32 %v660_v12, %v637_v9  ;;  %v402_v14 = vpop.f32.mrb[1].mxu0 }
  0xf3   : > { %v403_v15 = vadd.f32 %v637_v9, %v402_v14  ;;  %v661_v16 = vpop.f32.mrb[2].mxu0 }
  0xf4   : > { %v443_v17 = vmul.f32 %v434_v10, %v411_v13  ;;  %v414_v18 = vadd.f32 %v661_v16, %v637_v9  ;;  %v405_v19 = vpop.f32.mrb[3].mxu0 }
  0xf5   : > { %v441_v21 = vmul.f32 %v424_v11, %v403_v15  ;;  %v406_v22 = vadd.f32 %v637_v9, %v405_v19 }
  0xf6   : > { %v651_v23 = vpack.c.bf16 %v443_v17, %v443_v17  ;;  %v444_v25 = vmul.f32 %v439_v20, %v414_v18 }
  0xf7   : > { %v649_v26 = vpack.c.bf16 %v441_v21, %v441_v21  ;;  %v442_v27 = vmul.f32 %v429_v24, %v406_v22 }
  0xf8   : > { %464 = vst.msk [vmem:[%s333_s24 + $0x8] sm:$0xf] %vm461_vm1, %v651_v23  ;;  %v652_v28 = vpack.c.bf16 %v444_v25, %v444_v25 }
  0xf9   : > { %462 = vst.msk [vmem:[%s333_s24] sm:$0xf] %vm461_vm1, %v649_v26  ;;  %v650_v29 = vpack.c.bf16 %v442_v27, %v442_v27 }
  0xfa   : > { %465 = vst.msk [vmem:[%s333_s24 + $0xc] sm:$0xf] %vm461_vm1, %v652_v28 }
  0xfb   : > { %463 = vst.msk [vmem:[%s333_s24 + $0x4] sm:$0xf] %vm461_vm1, %v650_v29 }
  0xfc PF: > { %s14_s19 = sadd.s32 1, %s746_s19   ;;  %s849_s15 = smov %s738_s17 }
  0xfd   : > { %p11_p7 = scmp.ge.s32.totalorder %s14_s19, 14   ;;  %s850_s16 = smov %s742_s18 }
  0xfe   : > { %s851_s17 = smov %s854_s20  ;;  %s852_s18 = smov %s858_s21 }
  0xff   :  { %13 = sbr.rel (!%p11_p7) target bundleno = 3 (0x3), region = 75 }

</bundles_post_ra>
